<compile_context>
chip_gen: v5e
topology: v5e:2x2
jax: 0.10.0
libtpu: 0.0.40
codegen_flags: <defaults>
</compile_context>

<pallas_src>
import functools

import numpy as np
import jax
import jax.numpy as jnp
from jax.experimental import pallas as pl
from jax.experimental.pallas import tpu as pltpu


# ----------------------------- helpers -----------------------------

def _round_up(x, m):
    return ((x + m - 1) // m) * m


def _vmem_limit_bytes():
    cap = 64 * 1024 * 1024
    try:
        info = pltpu.get_tpu_info()
        cap = int(getattr(info, "vmem_capacity_bytes", cap))
    except Exception:
        pass
    # leave headroom below physical VMEM (v7x: 64 MiB -> 48 MiB; v5e/v6e: 128 -> 96 MiB)
    return min((cap * 3) // 4, 96 * 1024 * 1024)


_VMEM_LIMIT = _vmem_limit_bytes()
_VMEM = pl.BlockSpec(memory_space=pltpu.MemorySpace.VMEM)


# ----------------------------- Pallas kernels -----------------------------

def _matmul_bn_kernel(*refs, relu, has_residual):
    # (tm, Kp)_bf16 @ (Kp, tc)_bf16 on the MXU with f32 accumulation, then fused
    # per-channel BN scale/bias, optional residual add and optional ReLU.
    if has_residual:
        x_ref, w_ref, s_ref, b_ref, r_ref, o_ref = refs
    else:
        x_ref, w_ref, s_ref, b_ref, o_ref = refs
        r_ref = None
    acc = jnp.dot(x_ref[...], w_ref[...], preferred_element_type=jnp.float32)
    y = acc * s_ref[...] + b_ref[...]
    if r_ref is not None:
        y = y + r_ref[...]
    if relu:
        y = jnp.maximum(y, 0.0)
    o_ref[...] = y


def _max9_kernel(x_ref, o_ref):
    # x: (9, tm, C) -> max over the 9 pooling-window taps.
    o_ref[...] = jnp.max(x_ref[...], axis=0)


def _mean_hw_kernel(x_ref, o_ref):
    # x: (N, H*W, C) -> global average pool over spatial axis.
    o_ref[...] = jnp.mean(x_ref[...], axis=1)


# ----------------------------- glue / wrappers -----------------------------

def _im2col(x, kh, kw, stride, pad):
    """x: (N, H, W, C) NHWC -> (N*Ho*Wo, kh*kw*C) patches (pure data movement)."""
    N, H, W, C = x.shape
    Ho = (H + 2 * pad - kh) // stride + 1
    Wo = (W + 2 * pad - kw) // stride + 1
    if pad > 0:
        x = jnp.pad(x, ((0, 0), (pad, pad), (pad, pad), (0, 0)))
    cols = []
    for ky in range(kh):
        for kx in range(kw):
            cols.append(
                x[:, ky:ky + stride * (Ho - 1) + 1:stride,
                     kx:kx + stride * (Wo - 1) + 1:stride, :])
    patches = jnp.stack(cols, axis=3)  # (N, Ho, Wo, kh*kw, C)
    return patches.reshape(N * Ho * Wo, kh * kw * C), (N, Ho, Wo)


def conv_bn_act(x, p, *, stride, pad, relu, residual=None, eps=1e-5):
    """Fused Conv2d (no bias) + BatchNorm2d (running stats) + optional residual + ReLU."""
    w = p["w"]                          # PyTorch layout: (Cout, Cin, kh, kw)
    cout, cin, kh, kw = w.shape
    patches, (N, Ho, Wo) = _im2col(x, kh, kw, stride, pad)
    M, K = patches.shape

    wk = jnp.transpose(w, (2, 3, 1, 0)).reshape(kh * kw * cin, cout)
    scale_v = p["gamma"] * jax.lax.rsqrt(p["var"] + eps)
    bias_v = p["beta"] - p["mean"] * scale_v
    scale = scale_v.reshape(1, cout).astype(jnp.float32)
    bias = bias_v.reshape(1, cout).astype(jnp.float32)

    # --- tiling: M tiles x cout tiles, lane-aligned K ---
    tc = min(cout, 256)
    tm = 512 if M >= 512 else _round_up(M, 16)
    M_pad = _round_up(M, tm)
    K_pad = _round_up(K, 128)

    # bf16 MXU inputs, f32 accumulation.
    patches = patches.astype(jnp.bfloat16)
    wk = wk.astype(jnp.bfloat16)
    if K_pad != K:
        patches = jnp.pad(patches, ((0, 0), (0, K_pad - K)))
        wk = jnp.pad(wk, ((0, K_pad - K), (0, 0)))
    if M_pad != M:
        patches = jnp.pad(patches, ((0, M_pad - M), (0, 0)))

    in_specs = [
        pl.BlockSpec((tm, K_pad), lambda i, j: (i, 0)),   # patches: resident across j
        pl.BlockSpec((K_pad, tc), lambda i, j: (0, j)),   # weights
        pl.BlockSpec((1, tc), lambda i, j: (0, j)),       # bn scale
        pl.BlockSpec((1, tc), lambda i, j: (0, j)),       # bn bias
    ]
    operands = [patches, wk, scale, bias]

    has_residual = residual is not None
    if has_residual:
        r2 = residual.reshape(M, cout).astype(jnp.float32)
        if M_pad != M:
            r2 = jnp.pad(r2, ((0, M_pad - M), (0, 0)))
        in_specs.append(pl.BlockSpec((tm, tc), lambda i, j: (i, j)))
        operands.append(r2)

    num_m = M_pad // tm
    num_c = cout // tc

    flops = 2 * M_pad * K_pad * cout
    bytes_accessed = (int(patches.size) * 2 + int(wk.size) * 2
                      + M_pad * cout * 4 * (2 if has_residual else 1)
                      + 2 * cout * 4)

    out = pl.pallas_call(
        functools.partial(_matmul_bn_kernel, relu=relu, has_residual=has_residual),
        out_shape=jax.ShapeDtypeStruct((M_pad, cout), jnp.float32),
        grid=(num_m, num_c),
        in_specs=in_specs,
        out_specs=pl.BlockSpec((tm, tc), lambda i, j: (i, j)),
        compiler_params=pltpu.CompilerParams(
            dimension_semantics=("parallel", "parallel"),
            vmem_limit_bytes=_VMEM_LIMIT),
        cost_estimate=pl.CostEstimate(
            flops=flops, transcendentals=0, bytes_accessed=bytes_accessed),
    )(*operands)

    if M_pad != M:
        out = out[:M]
    return out.reshape(N, Ho, Wo, cout)


def maxpool_3x3_s2_p1(x):
    N, H, W, C = x.shape
    Ho = (H + 2 - 3) // 2 + 1
    Wo = (W + 2 - 3) // 2 + 1
    xp = jnp.pad(x, ((0, 0), (1, 1), (1, 1), (0, 0)), constant_values=-np.inf)
    cols = []
    for ky in range(3):
        for kx in range(3):
            cols.append(xp[:, ky:ky + 2 * (Ho - 1) + 1:2,
                              kx:kx + 2 * (Wo - 1) + 1:2, :])
    stacked = jnp.stack(cols, axis=0).reshape(9, N * Ho * Wo, C)

    M = N * Ho * Wo
    tm = 1024 if M >= 1024 else _round_up(M, 8)
    M_pad = _round_up(M, tm)
    if M_pad != M:
        stacked = jnp.pad(stacked, ((0, 0), (0, M_pad - M), (0, 0)),
                          constant_values=-np.inf)

    out = pl.pallas_call(
        _max9_kernel,
        out_shape=jax.ShapeDtypeStruct((M_pad, C), jnp.float32),
        grid=(M_pad // tm,),
        in_specs=[pl.BlockSpec((9, tm, C), lambda i: (0, i, 0))],
        out_specs=pl.BlockSpec((tm, C), lambda i: (i, 0)),
        compiler_params=pltpu.CompilerParams(
            dimension_semantics=("parallel",),
            vmem_limit_bytes=_VMEM_LIMIT),
    )(stacked)
    if M_pad != M:
        out = out[:M]
    return out.reshape(N, Ho, Wo, C)


def global_avgpool(x):
    N, H, W, C = x.shape
    x2 = x.reshape(N, H * W, C)
    return pl.pallas_call(
        _mean_hw_kernel,
        out_shape=jax.ShapeDtypeStruct((N, C), jnp.float32),
        in_specs=[_VMEM],
        out_specs=_VMEM,
        compiler_params=pltpu.CompilerParams(vmem_limit_bytes=_VMEM_LIMIT),
    )(x2)


# ----------------------------- parameters -----------------------------

def _make_conv_bn(rng, cin, cout, k):
    fan_in = cin * k * k
    w = rng.normal(0.0, np.sqrt(2.0 / fan_in), size=(cout, cin, k, k)).astype(np.float32)
    return {
        "w": jnp.asarray(w),
        "gamma": jnp.asarray(rng.uniform(0.5, 1.0, size=(cout,)).astype(np.float32)),
        "beta": jnp.asarray(rng.normal(0.0, 0.01, size=(cout,)).astype(np.float32)),
        "mean": jnp.zeros((cout,), jnp.float32),
        "var": jnp.ones((cout,), jnp.float32),
    }


def make_resnet152_params(seed=0):
    rng = np.random.default_rng(seed)
    params = {"stem": _make_conv_bn(rng, 3, 64, 7)}
    # resnet152 bottleneck config: [3, 8, 36, 3], expansion=4, stride on 3x3 conv
    cfg = [("layer1", 64, 3, 1), ("layer2", 128, 8, 2),
           ("layer3", 256, 36, 2), ("layer4", 512, 3, 2)]
    in_planes = 64
    for name, planes, nblocks, stride in cfg:
        blocks = []
        for b in range(nblocks):
            s = stride if b == 0 else 1
            blk = {
                "conv1": _make_conv_bn(rng, in_planes, planes, 1),
                "conv2": _make_conv_bn(rng, planes, planes, 3),
                "conv3": _make_conv_bn(rng, planes, planes * 4, 1),
                "stride": s,
            }
            if b == 0:
                blk["down"] = _make_conv_bn(rng, in_planes, planes * 4, 1)
            blocks.append(blk)
            in_planes = planes * 4
        params[name] = blocks
    return params


# ----------------------------- forward -----------------------------

def _bottleneck(x, blk):
    s = blk["stride"]
    out = conv_bn_act(x, blk["conv1"], stride=1, pad=0, relu=True)
    out = conv_bn_act(out, blk["conv2"], stride=s, pad=1, relu=True)
    if "down" in blk:
        identity = conv_bn_act(x, blk["down"], stride=s, pad=0, relu=False)
    else:
        identity = x
    # conv3 + BN + residual add + ReLU fused into one MXU kernel epilogue.
    return conv_bn_act(out, blk["conv3"], stride=1, pad=0, relu=True,
                       residual=identity)


def resnet152_forward(x_nchw, params, get_ha=True):
    x = jnp.transpose(x_nchw, (0, 2, 3, 1)).astype(jnp.float32)    # NCHW -> NHWC
    x = conv_bn_act(x, params["stem"], stride=2, pad=3, relu=True)  # conv1+bn1+relu
    x = maxpool_3x3_s2_p1(x)
    feats = []
    for name in ("layer1", "layer2", "layer3", "layer4"):
        for blk in params[name]:
            x = _bottleneck(x, blk)
        feats.append(x)
    pool = global_avgpool(x)                                        # (N, 2048)
    to_nchw = lambda t: jnp.transpose(t, (0, 3, 1, 2))
    b1, b2, b3, b4 = (to_nchw(f) for f in feats)
    pool = pool.reshape(pool.shape[0], pool.shape[1], 1, 1)         # (N, 2048, 1, 1)
    if get_ha:
        return b1, b2, b3, b4, pool
    return pool


# ----------------------------- main -----------------------------

if __name__ == "__main__":
    params = make_resnet152_params(seed=0)
    x = jax.random.normal(jax.random.PRNGKey(0), (2, 3, 64, 64), dtype=jnp.float32)

    outs = resnet152_forward(x, params, get_ha=True)
    outs = jax.block_until_ready(outs)

    expected = [(2, 256, 16, 16), (2, 512, 8, 8), (2, 1024, 4, 4),
                (2, 2048, 2, 2), (2, 2048, 1, 1)]
    got = [tuple(o.shape) for o in outs]
    assert got == expected, (got, expected)
    assert all(bool(jnp.all(jnp.isfinite(o))) for o in outs)
    print("KERNEL_OK")
</pallas_src>

<mosaic_0001>
module attributes {stable_mosaic.version = 11 : i64} {
  func.func @_matmul_bn_kernel(%arg0: i32, %arg1: i32, %arg2: memref<512x256xbf16, #tpu.memory_space<vmem>>, %arg3: memref<256x64xbf16, #tpu.memory_space<vmem>>, %arg4: memref<1x64xf32, #tpu.memory_space<vmem>>, %arg5: memref<1x64xf32, #tpu.memory_space<vmem>>, %arg6: memref<512x64xf32, #tpu.memory_space<vmem>>) attributes {dimension_semantics = [#tpu.dimension_semantics<parallel>, #tpu.dimension_semantics<parallel>], iteration_bounds = array<i64: 4, 1>, scalar_prefetch = 0 : i64, scratch_operands = 0 : i64, tpu.core_type = #tpu.core_type<tc>, window_params = [{transform_indices = @transform_0, window_bounds = array<i64: 512, 256>}, {transform_indices = @transform_1, window_bounds = array<i64: 256, 64>}, {transform_indices = @transform_2, window_bounds = array<i64: 1, 64>}, {transform_indices = @transform_3, window_bounds = array<i64: 1, 64>}, {transform_indices = @transform_4, window_bounds = array<i64: 512, 64>}]} {
    %c0 = arith.constant 0 : index
    %c0_0 = arith.constant 0 : index
    %0 = vector.load %arg2[%c0, %c0_0] : memref<512x256xbf16, #tpu.memory_space<vmem>>, vector<512x256xbf16>
    %c0_1 = arith.constant 0 : index
    %c0_2 = arith.constant 0 : index
    %1 = vector.load %arg3[%c0_1, %c0_2] : memref<256x64xbf16, #tpu.memory_space<vmem>>, vector<256x64xbf16>
    %cst = arith.constant dense<0.000000e+00> : vector<512x64xf32>
    %2 = tpu.matmul %0, %1, %cst {dimension_numbers = #tpu.dot_dimension_numbers<[1], [0], [0], [1], [0, 0, 1, 1], [], []>} : vector<512x256xbf16>, vector<256x64xbf16>, vector<512x64xf32> -> vector<512x64xf32>
    %c0_3 = arith.constant 0 : index
    %c0_4 = arith.constant 0 : index
    %3 = vector.load %arg4[%c0_3, %c0_4] : memref<1x64xf32, #tpu.memory_space<vmem>>, vector<1x64xf32>
    %4 = vector.broadcast %3 : vector<1x64xf32> to vector<512x64xf32>
    %5 = arith.mulf %2, %4 : vector<512x64xf32>
    %c0_5 = arith.constant 0 : index
    %c0_6 = arith.constant 0 : index
    %6 = vector.load %arg5[%c0_5, %c0_6] : memref<1x64xf32, #tpu.memory_space<vmem>>, vector<1x64xf32>
    %7 = vector.broadcast %6 : vector<1x64xf32> to vector<512x64xf32>
    %8 = arith.addf %5, %7 : vector<512x64xf32>
    %cst_7 = arith.constant 0.000000e+00 : f32
    %9 = vector.broadcast %cst_7 : f32 to vector<512x64xf32>
    %10 = arith.maximumf %8, %9 : vector<512x64xf32>
    %c0_8 = arith.constant 0 : index
    %c0_9 = arith.constant 0 : index
    %11 = vector.load %arg6[%c0_8, %c0_9] : memref<512x64xf32, #tpu.memory_space<vmem>>, vector<512x64xf32>
    tpu.vector_store %arg6[%c0_8, %c0_9], %10 {strides = array<i32>} : memref<512x64xf32, #tpu.memory_space<vmem>>, vector<512x64xf32>,
    return
  }
  func.func @transform_0(%arg0: i32, %arg1: i32) -> (i32, i32) {
    %c0_i32 = arith.constant 0 : i32
    %c0_i32_0 = arith.constant 0 : i32
    return %arg0, %c0_i32 : i32, i32
  }
  func.func @transform_1(%arg0: i32, %arg1: i32) -> (i32, i32) {
    %c0_i32 = arith.constant 0 : i32
    %c0_i32_0 = arith.constant 0 : i32
    return %c0_i32, %arg1 : i32, i32
  }
  func.func @transform_2(%arg0: i32, %arg1: i32) -> (i32, i32) {
    %c0_i32 = arith.constant 0 : i32
    %c0_i32_0 = arith.constant 0 : i32
    return %c0_i32, %arg1 : i32, i32
  }
  func.func @transform_3(%arg0: i32, %arg1: i32) -> (i32, i32) {
    %c0_i32 = arith.constant 0 : i32
    %c0_i32_0 = arith.constant 0 : i32
    return %c0_i32, %arg1 : i32, i32
  }
  func.func @transform_4(%arg0: i32, %arg1: i32) -> (i32, i32) {
    %c0_i32 = arith.constant 0 : i32
    return %arg0, %arg1 : i32, i32
  }
}

</mosaic_0001>

<bundles_post_ra>
// kernel: tpu_custom_call.1
= control target key start
LH: loop header
LB: loop body
LE: loop exit
PB: predicated region body
PF: predicated region fallthrough
CT: control target
= control target key end

     0   :  { %9 = vsyncpa [#allocation3], 0  ;;  %s2655_s0 = inlined_call_operand.hbm [shape: bf16[2048,256], index: 0, kind: input, shape index: {}]   ;;  %s2656_s1 = inlined_call_operand.vmem [shape: bf16[256,64], index: 1, kind: input, shape index: {}]   ;;  %s2657_s2 = inlined_call_operand.vmem [shape: f32[1,64], index: 2, kind: input, shape index: {}]   ;;  %s2658_s3 = inlined_call_operand.vmem [shape: f32[1,64], index: 3, kind: input, shape index: {}]   ;;  %s2659_s4 = inlined_call_operand.vmem [shape: f32[2048,64], index: 4, kind: output, shape index: {}]  }
   0x1   :  { %11 = vsyncpa [#allocation3 + $0x1], 0  ;;  %s2133_s15 = smov 0   ;;  %s2135_s16 = smov 0  }
   0x2   :  { %s2137_s17 = smov 0   ;;  %s2139_s18 = smov 0  }
   0x3   :  { %s2141_s19 = smov 0   ;;  %s2143_s20 = smov 0  }
   0x4 LB: > { %s1528_s21 = sadd.s32 4294967295, %s2104_s20   ;;  %s29_s22 = sadd.s32 1, %s2100_s19  ;;  %s2104_s20 = sphi %s2143_s20, %s17_s20   ;;  %s2100_s19 = sphi %s2141_s19, %s2666_s19   ;;  %s2096_s18 = sphi %s2139_s18, %s2665_s18   ;;  %s2092_s17 = sphi %s2137_s17, %s2664_s17   ;;  %s2088_s16 = sphi %s2135_s16, %s2663_s16   ;;  %s2084_s15 = sphi %s2133_s15, %s2662_s15  }
   0x5   : > { %p31_p0 = scmp.ge.s32.totalorder %s29_s22, 4  ;;  %s36_s23 = sadd.s32 1, %s2092_s17 }
   0x6   : > { %p43_p1 = scmp.ne.s32.totalorder %s2092_s17, %s2088_s16  ;;  %p44_p2 = scmp.eq.s32.totalorder %s2104_s20, 0 }
   0x7   : > { %s2668_s22 = smov (%p31_p0, %s29_s22), 0  ;;  %p49_p4 = scmp.ne.s32.totalorder %s2088_s16, %s2084_s15 }
   0x8   : > { %p2169_p3 = por %p44_p2, %p43_p1  ;;  %s33_s25 = ssub.s32 %s2100_s19, %s2668_s22 }
   0x9   : > { %p50_p5 = scmp.eq.s32.totalorder %s1528_s21, 0  ;;  %p34_p6 = scmp.eq.s32.totalorder %s33_s25, 0 }
   0xa   : > { %p1969_p8 = scmp.lt.s32.totalorder %s2104_s20, 4  ;;  %s198_s28 = sand.u32 1, %s2092_s17  }
   0xb   : > { %p2176_p7 = por %p50_p5, %p49_p4  ;;  %s1866_s29 = sshll.u32 %s2100_s19, 9 }
   0xc   : > { %s2182_s27 = scalar_select %p34_p6, %s2092_s17, %s36_s23  }
   0xd   : > { %s1535_s30 = sshll.u32 %s198_s28, 9  ;;  %s208_s7 = scalar_lea.hbm %s2655_s0, %s1866_s29 }
   0xe   : > { %s209_s8 = sshll.u32 %s208_s7, 4  ;;  %s202_s9 = scalar_lea.vmem [#allocation2], %s1535_s30  ;;  %s210_s8 = int_to_ptr.hbm [resolvable:$true] %s209_s8 }
   0xf   : > { %s211_s10 = sshll.u32 %s202_s9, 4  ;;  %p1966_p9 = pnand %p1969_p8, %p2169_p3  ;;  %s212_s10 = int_to_ptr.vmem [resolvable:$true] %s211_s10 }
  0x10   : > { %p1539_p10 = scmp.ge.s32.totalorder %s2104_s20, 1  ;;  %p219_p11 = scmp.lt.s32.totalorder %s2104_s20, 5 }
  0x11   : > { %s199_s11 = scalar_lea.sflag [#allocation3], %s198_s28  ;;  %s2106_s12 = smov 128  }
  0x12   : > { %s2107_s13 = smov 8   ;;  %p220_p12 = pnand %p1539_p10, %p219_p11 }
  0x13   : > { %1968 = dma.hbm_to_vmem [thread:$0]  (!%p1966_p9), %s210_s8, 8192, %s212_s10, %s199_s11, %s2106_s12, %s2106_s12, %s2107_s13  }
  0x14   : > { %223 = sbr.rel (%p220_p12) target bundleno = 448 (0x1c0), region = 36  ;;  %s225_s14 = sand.u32 (!%p220_p12), 1, %s2088_s16  }
  0x15   : > { %s1540_s15 = sshll.u32 (!%p220_p12), %s225_s14, 9  ;;  %s226_s21 = scalar_lea.sflag (!%p220_p12), [#allocation3], %s225_s14 }
  0x16   : > { %s2194_s23 = scalar_lea.vmem (!%p220_p12), [#allocation2], %s1540_s15 }
  0x19   : > { %2079 = dma.done.wait (%p2176_p7), %s226_s21, 8192  }
  0x1a   : > { %2081 = vsyncadd (%p2176_p7), %s226_s21, 4294959104  ;;  %v1938_v0 = vld [vmem:[%s2656_s1 + $0x38] sm:$0xff]  ;;  %v1937_v2 = vld [vmem:[%s2656_s1 + $0x30] sm:$0xff]  ;;  %s1541_s13 = sshll.u32 %s2096_s18, 6  ;;  %vm1338_vm0 = vcmask 523264  }
  0x1b   : > { %v1946_v1 = vld [vmem:[%s2656_s1 + $0x78] sm:$0xff]  ;;  %800 = vmatpush.bf16.msra.mxu0 %v1938_v0  ;;  %1947 = vmatpush.bf16.msra.mxu2 %v1938_v0  ;;  %v1945_v3 = vld [vmem:[%s2656_s1 + $0x70] sm:$0xff]  ;;  %v1936_v4 = vld [vmem:[%s2656_s1 + $0x28] sm:$0xff]  ;;  %p280_p13 = scmp.lt.s32.totalorder %s1541_s13, 255 }
  0x1c   : > { %969 = vmatpush.bf16.msra.mxu1 %v1946_v1  ;;  %1955 = vmatpush.bf16.msra.mxu3 %v1946_v1  ;;  %v1944_v5 = vld [vmem:[%s2656_s1 + $0x68] sm:$0xff]  ;;  %v1935_v6 = vld [vmem:[%s2656_s1 + $0x20] sm:$0xff]  ;;  %v1934_v8 = vld [vmem:[%s2656_s1 + $0x18] sm:$0xff] }
  0x1d   : > { %v1943_v7 = vld [vmem:[%s2656_s1 + $0x60] sm:$0xff]  ;;  %v1942_v9 = vld [vmem:[%s2656_s1 + $0x58] sm:$0xff]  ;;  %v1933_v10 = vld [vmem:[%s2656_s1 + $0x10] sm:$0xff]  ;;  %s2670_s13 = smov (!%p280_p13, %s1541_s13), 255 }
  0x1e   : > { %v1941_v11 = vld [vmem:[%s2656_s1 + $0x50] sm:$0xff]  ;;  %v1932_v12 = vld [vmem:[%s2656_s1 + $0x8] sm:$0xff]  ;;  %v1931_v14 = vld [vmem:[%s2656_s1] sm:$0xff]  ;;  %s1542_s24 = sshll.u32 %s2670_s13, 3 }
  0x1f   : > { %801 = vmatpush.bf16.msra.mxu0 %v1937_v2  ;;  %1948 = vmatpush.bf16.msra.mxu2 %v1937_v2  ;;  %v1940_v13 = vld [vmem:[%s2656_s1 + $0x48] sm:$0xff]  ;;  %v1939_v15 = vld [vmem:[%s2656_s1 + $0x40] sm:$0xff]  ;;  %v1553_v28 = vld [vmem:[%s2194_s23 + $0x10] sm:$0xf]  ;;  %s2336_s29 = scalar_lea.vmem %s2659_s4, %s1542_s24 }
  0x20   : > { %970 = vmatpush.bf16.msra.mxu1 %v1945_v3  ;;  %1956 = vmatpush.bf16.msra.mxu3 %v1945_v3  ;;  %v1545_v16 = vld [vmem:[%s2194_s23] sm:$0xf]  ;;  %v1868_v17 = vld [vmem:[%s2194_s23 + $0x4] sm:$0xf0]  ;;  %v1867_v20 = vld [vmem:[%s2194_s23 + $0x4] sm:$0xf] }
  0x21   : > { %v1673_v18 = vld [vmem:[%s2194_s23 + $0x100] sm:$0xf]  ;;  %v1900_v19 = vld [vmem:[%s2194_s23 + $0x104] sm:$0xf0]  ;;  %v1547_v21 = vld [vmem:[%s2194_s23 + $0x8] sm:$0xf0]  ;;  %v1546_v24 = vor.u32 %v1868_v17, %v1545_v16 }
  0x22   : > { %v1899_v22 = vld [vmem:[%s2194_s23 + $0x104] sm:$0xf]  ;;  %v1675_v23 = vld [vmem:[%s2194_s23 + $0x108] sm:$0xf0]  ;;  %v1674_v25 = vor.u32 %v1900_v19, %v1673_v18  ;;  %v1550_v26 = vor.u32 %v1867_v20, %v1547_v21  ;;  %v1870_v29 = vld [vmem:[%s2194_s23 + $0x14] sm:$0xf0] }
  0x23   : > { %802 = vmatpush.bf16.msra.mxu0 %v1936_v4  ;;  %1949 = vmatpush.bf16.msra.mxu2 %v1936_v4  ;;  %v1678_v27 = vor.u32 %v1899_v22, %v1675_v23  ;;  %v1681_v30 = vld [vmem:[%s2194_s23 + $0x110] sm:$0xf]  ;;  %v1902_v31 = vld [vmem:[%s2194_s23 + $0x114] sm:$0xf0]  ;;  %v1869_v32 = vld [vmem:[%s2194_s23 + $0x14] sm:$0xf]  ;;  %v1554_v36 = vor.u32 %v1870_v29, %v1553_v28 }
  0x24   : > { %971 = vmatpush.bf16.msra.mxu1 %v1944_v5  ;;  %1957 = vmatpush.bf16.msra.mxu3 %v1944_v5  ;;  %v1555_v33 = vld [vmem:[%s2194_s23 + $0x18] sm:$0xf0]  ;;  %v1901_v34 = vld [vmem:[%s2194_s23 + $0x114] sm:$0xf]  ;;  %v1682_v37 = vor.u32 %v1902_v31, %v1681_v30  ;;  %v1561_v40 = vld [vmem:[%s2194_s23 + $0x20] sm:$0xf] }
  0x25   : > { %v1683_v35 = vld [vmem:[%s2194_s23 + $0x118] sm:$0xf0]  ;;  %v1558_v38 = vor.u32 %v1869_v32, %v1555_v33  ;;  %v1872_v41 = vld [vmem:[%s2194_s23 + $0x24] sm:$0xf0]  ;;  %v1689_v42 = vld [vmem:[%s2194_s23 + $0x120] sm:$0xf] }
  0x26   : > { %v1686_v39 = vor.u32 %v1901_v34, %v1683_v35  ;;  %v1904_v43 = vld [vmem:[%s2194_s23 + $0x124] sm:$0xf0]  ;;  %v1871_v44 = vld [vmem:[%s2194_s23 + $0x24] sm:$0xf]  ;;  %v1563_v45 = vld [vmem:[%s2194_s23 + $0x28] sm:$0xf0]  ;;  %v1562_v48 = vor.u32 %v1872_v41, %v1561_v40 }
  0x27   : > { %803 = vmatpush.bf16.msra.mxu0 %v1935_v6  ;;  %1950 = vmatpush.bf16.msra.mxu2 %v1935_v6  ;;  %v1903_v46 = vld [vmem:[%s2194_s23 + $0x124] sm:$0xf]  ;;  %v1691_v47 = vld [vmem:[%s2194_s23 + $0x128] sm:$0xf0]  ;;  %v1690_v49 = vor.u32 %v1904_v43, %v1689_v42  ;;  %v1566_v50 = vor.u32 %v1871_v44, %v1563_v45  ;;  %v1569_v52 = vld [vmem:[%s2194_s23 + $0x30] sm:$0xf] }
  0x28   : > { %972 = vmatpush.bf16.msra.mxu1 %v1943_v7  ;;  %1958 = vmatpush.bf16.msra.mxu3 %v1943_v7  ;;  %v1694_v51 = vor.u32 %v1903_v46, %v1691_v47  ;;  %v1874_v53 = vld [vmem:[%s2194_s23 + $0x34] sm:$0xf0]  ;;  %v1697_v54 = vld [vmem:[%s2194_s23 + $0x130] sm:$0xf]  ;;  %v1873_v56 = vld [vmem:[%s2194_s23 + $0x34] sm:$0xf] }
  0x29   : > { %v1906_v55 = vld [vmem:[%s2194_s23 + $0x134] sm:$0xf0]  ;;  %v1571_v57 = vld [vmem:[%s2194_s23 + $0x38] sm:$0xf0]  ;;  %v1905_v58 = vld [vmem:[%s2194_s23 + $0x134] sm:$0xf]  ;;  %v1570_v60 = vor.u32 %v1874_v53, %v1569_v52 }
  0x2a   : > { %v1699_v59 = vld [vmem:[%s2194_s23 + $0x138] sm:$0xf0]  ;;  %v1698_v61 = vor.u32 %v1906_v55, %v1697_v54  ;;  %v1574_v62 = vor.u32 %v1873_v56, %v1571_v57  ;;  %v1577_v0 = vld [vmem:[%s2194_s23 + $0x40] sm:$0xf]  ;;  %v1876_v1 = vld [vmem:[%s2194_s23 + $0x44] sm:$0xf0] }
  0x2b   : > { %804 = vmatpush.bf16.msra.mxu0 %v1934_v8  ;;  %1951 = vmatpush.bf16.msra.mxu2 %v1934_v8  ;;  %v1702_v63 = vor.u32 %v1905_v58, %v1699_v59  ;;  %v1705_v2 = vld [vmem:[%s2194_s23 + $0x140] sm:$0xf]  ;;  %v1908_v3 = vld [vmem:[%s2194_s23 + $0x144] sm:$0xf0]  ;;  %v1875_v4 = vld [vmem:[%s2194_s23 + $0x44] sm:$0xf]  ;;  %v1578_v8 = vor.u32 %v1876_v1, %v1577_v0 }
  0x2c   : > { %973 = vmatpush.bf16.msra.mxu1 %v1942_v9  ;;  %1959 = vmatpush.bf16.msra.mxu3 %v1942_v9  ;;  %v1579_v5 = vld [vmem:[%s2194_s23 + $0x48] sm:$0xf0]  ;;  %v1907_v6 = vld [vmem:[%s2194_s23 + $0x144] sm:$0xf]  ;;  %v1706_v9 = vor.u32 %v1908_v3, %v1705_v2  ;;  %v1877_v16 = vld [vmem:[%s2194_s23 + $0x54] sm:$0xf] }
  0x2d   : > { %v1707_v7 = vld [vmem:[%s2194_s23 + $0x148] sm:$0xf0]  ;;  %v1587_v17 = vld [vmem:[%s2194_s23 + $0x58] sm:$0xf0]  ;;  %v1909_v18 = vld [vmem:[%s2194_s23 + $0x154] sm:$0xf] }
  0x2e   : > { %v1715_v19 = vld [vmem:[%s2194_s23 + $0x158] sm:$0xf0]  ;;  %v1590_v22 = vor.u32 %v1877_v16, %v1587_v17  ;;  %v1879_v28 = vld [vmem:[%s2194_s23 + $0x64] sm:$0xf]  ;;  %v1595_v29 = vld [vmem:[%s2194_s23 + $0x68] sm:$0xf0] }
  0x2f   : > { %805 = vmatpush.bf16.msra.mxu0 %v1933_v10  ;;  %1952 = vmatpush.bf16.msra.mxu2 %v1933_v10  ;;  %v1582_v10 = vor.u32 %v1875_v4, %v1579_v5  ;;  %v1718_v23 = vor.u32 %v1909_v18, %v1715_v19  ;;  %v1911_v30 = vld [vmem:[%s2194_s23 + $0x164] sm:$0xf]  ;;  %v1723_v31 = vld [vmem:[%s2194_s23 + $0x168] sm:$0xf0]  ;;  %v1598_v34 = vor.u32 %v1879_v28, %v1595_v29  ;;  %v1881_v40 = vld [vmem:[%s2194_s23 + $0x74] sm:$0xf] }
  0x30   : > { %974 = vmatpush.bf16.msra.mxu1 %v1941_v11  ;;  %1960 = vmatpush.bf16.msra.mxu3 %v1941_v11  ;;  %v1710_v11 = vor.u32 %v1907_v6, %v1707_v7  ;;  %v1726_v35 = vor.u32 %v1911_v30, %v1723_v31  ;;  %v1603_v41 = vld [vmem:[%s2194_s23 + $0x78] sm:$0xf0]  ;;  %v1913_v42 = vld [vmem:[%s2194_s23 + $0x174] sm:$0xf]  ;;  %v1883_v52 = vld [vmem:[%s2194_s23 + $0x84] sm:$0xf] }
  0x31   : > { %v1731_v43 = vld [vmem:[%s2194_s23 + $0x178] sm:$0xf0]  ;;  %v1606_v46 = vor.u32 %v1881_v40, %v1603_v41  ;;  %v1611_v53 = vld [vmem:[%s2194_s23 + $0x88] sm:$0xf0]  ;;  %v1915_v54 = vld [vmem:[%s2194_s23 + $0x184] sm:$0xf] }
  0x32   : > { %v1734_v47 = vor.u32 %v1913_v42, %v1731_v43  ;;  %v1739_v55 = vld [vmem:[%s2194_s23 + $0x188] sm:$0xf0]  ;;  %v2324_v59 = vld [vmem:[%s2657_s2] ss:$0 sm:$0xff]  ;;  %v1918_v16 = vld [vmem:[%s2194_s23 + $0x194] sm:$0xf0] }
  0x33   : > { %806 = vmatpush.bf16.msra.mxu0 %v1932_v12  ;;  %1953 = vmatpush.bf16.msra.mxu2 %v1932_v12  ;;  %v1585_v12 = vld [vmem:[%s2194_s23 + $0x50] sm:$0xf]  ;;  %v2329_v0 = vld [vmem:[%s2658_s3] ss:$0 sm:$0xff]  ;;  %v1885_v17 = vld [vmem:[%s2194_s23 + $0x94] sm:$0xf] }
  0x34   : > { %975 = vmatpush.bf16.msra.mxu1 %v1940_v13  ;;  %1961 = vmatpush.bf16.msra.mxu3 %v1940_v13  ;;  %v1878_v13 = vld [vmem:[%s2194_s23 + $0x54] sm:$0xf0]  ;;  %v1619_v18 = vld [vmem:[%s2194_s23 + $0x98] sm:$0xf0]  ;;  %v1917_v19 = vld [vmem:[%s2194_s23 + $0x194] sm:$0xf] }
  0x35   : > { %v1586_v20 = vor.u32 %v1878_v13, %v1585_v12  ;;  %v1886_v12 = vld [vmem:[%s2194_s23 + $0x94] sm:$0xf0]  ;;  %v1622_v30 = vor.u32 %v1885_v17, %v1619_v18 }
  0x37   : > { %807 = vmatpush.bf16.msra.mxu0 %v1931_v14  ;;  %1954 = vmatpush.bf16.msra.mxu2 %v1931_v14  ;;  %v1713_v14 = vld [vmem:[%s2194_s23 + $0x150] sm:$0xf] }
  0x38   : > { %976 = vmatpush.bf16.msra.mxu1 %v1939_v15  ;;  %1962 = vmatpush.bf16.msra.mxu3 %v1939_v15  ;;  %v1910_v15 = vld [vmem:[%s2194_s23 + $0x154] sm:$0xf0] }
  0x39   : > { %v1714_v21 = vor.u32 %v1910_v15, %v1713_v14  ;;  %v1745_v15 = vld [vmem:[%s2194_s23 + $0x190] sm:$0xf] }
  0x3a   : > { %808 = vmatmul.bf16.vlgmr.msra.gmra.mxu0 %v1546_v24  ;;  %888 = vmatmul.bf16.vlgmr.msra.gmra.mxu2 %v1674_v25  ;;  %v1593_v24 = vld [vmem:[%s2194_s23 + $0x60] sm:$0xf]  ;;  %v1880_v25 = vld [vmem:[%s2194_s23 + $0x64] sm:$0xf0] }
  0x3b   : > { %977 = vmatmul.bf16.vlgmr.msra.gmra.mxu1 %v1550_v26  ;;  %1057 = vmatmul.bf16.vlgmr.msra.gmra.mxu3 %v1678_v27  ;;  %v1721_v26 = vld [vmem:[%s2194_s23 + $0x160] sm:$0xf]  ;;  %v1912_v27 = vld [vmem:[%s2194_s23 + $0x164] sm:$0xf0]  ;;  %v1594_v32 = vor.u32 %v1880_v25, %v1593_v24 }
  0x3c   : > { %v1722_v33 = vor.u32 %v1912_v27, %v1721_v26  ;;  %v1746_v26 = vor.u32 %v1918_v16, %v1745_v15 }
  0x4a   : > { %813 = vmatmul.bf16.gmra.mxu0 %v1554_v36  ;;  %893 = vmatmul.bf16.gmra.mxu2 %v1682_v37  ;;  %v1601_v36 = vld [vmem:[%s2194_s23 + $0x70] sm:$0xf]  ;;  %v1882_v37 = vld [vmem:[%s2194_s23 + $0x74] sm:$0xf0] }
  0x4b   : > { %982 = vmatmul.bf16.gmra.mxu1 %v1558_v38  ;;  %1062 = vmatmul.bf16.gmra.mxu3 %v1686_v39  ;;  %v1729_v38 = vld [vmem:[%s2194_s23 + $0x170] sm:$0xf]  ;;  %v1914_v39 = vld [vmem:[%s2194_s23 + $0x174] sm:$0xf0]  ;;  %v1602_v44 = vor.u32 %v1882_v37, %v1601_v36 }
  0x4c   : > { %v1730_v45 = vor.u32 %v1914_v39, %v1729_v38 }
  0x5a   : > { %818 = vmatmul.bf16.gmra.mxu0 %v1562_v48  ;;  %898 = vmatmul.bf16.gmra.mxu2 %v1690_v49  ;;  %v1609_v48 = vld [vmem:[%s2194_s23 + $0x80] sm:$0xf]  ;;  %v1884_v49 = vld [vmem:[%s2194_s23 + $0x84] sm:$0xf0] }
  0x5b   : > { %987 = vmatmul.bf16.gmra.mxu1 %v1566_v50  ;;  %1067 = vmatmul.bf16.gmra.mxu3 %v1694_v51  ;;  %v1737_v50 = vld [vmem:[%s2194_s23 + $0x180] sm:$0xf]  ;;  %v1916_v51 = vld [vmem:[%s2194_s23 + $0x184] sm:$0xf0]  ;;  %v1610_v56 = vor.u32 %v1884_v49, %v1609_v48 }
  0x5c   : > { %v1738_v57 = vor.u32 %v1916_v51, %v1737_v50  ;;  %v1888_v48 = vld [vmem:[%s2194_s23 + $0xa4] sm:$0xf0]  ;;  %v1753_v51 = vld [vmem:[%s2194_s23 + $0x1a0] sm:$0xf] }
  0x6a   : > { %823 = vmatmul.bf16.gmra.mxu0 %v1570_v60  ;;  %903 = vmatmul.bf16.gmra.mxu2 %v1698_v61  ;;  %v1614_v60 = vor.u32 %v1883_v52, %v1611_v53  ;;  %v1742_v61 = vor.u32 %v1915_v54, %v1739_v55  ;;  %v1920_v52 = vld [vmem:[%s2194_s23 + $0x1a4] sm:$0xf0]  ;;  %v1887_v53 = vld [vmem:[%s2194_s23 + $0xa4] sm:$0xf]  ;;  %v1627_v54 = vld [vmem:[%s2194_s23 + $0xa8] sm:$0xf0] }
  0x6b   : > { %992 = vmatmul.bf16.gmra.mxu1 %v1574_v62  ;;  %1072 = vmatmul.bf16.gmra.mxu3 %v1702_v63  ;;  %v1919_v55 = vld [vmem:[%s2194_s23 + $0x1a4] sm:$0xf] }
  0x7a   : > { %828 = vmatmul.bf16.gmra.mxu0 %v1578_v8  ;;  %908 = vmatmul.bf16.gmra.mxu2 %v1706_v9 }
  0x7b   : > { %997 = vmatmul.bf16.gmra.mxu1 %v1582_v10  ;;  %1077 = vmatmul.bf16.gmra.mxu3 %v1710_v11  ;;  %v1617_v11 = vld [vmem:[%s2194_s23 + $0x90] sm:$0xf] }
  0x7c   : > { %v1618_v25 = vor.u32 %v1886_v12, %v1617_v11 }
  0x8a   : > { %833 = vmatmul.bf16.gmra.mxu0 %v1586_v20  ;;  %913 = vmatmul.bf16.gmra.mxu2 %v1714_v21  ;;  %v1747_v20 = vld [vmem:[%s2194_s23 + $0x198] sm:$0xf0] }
  0x8b   : > { %1002 = vmatmul.bf16.gmra.mxu1 %v1590_v22  ;;  %1082 = vmatmul.bf16.gmra.mxu3 %v1718_v23  ;;  %v1750_v31 = vor.u32 %v1917_v19, %v1747_v20 }
  0x9a   : > { %838 = vmatmul.bf16.gmra.mxu0 %v1594_v32  ;;  %918 = vmatmul.bf16.gmra.mxu2 %v1722_v33 }
  0x9b   : > { %1007 = vmatmul.bf16.gmra.mxu1 %v1598_v34  ;;  %1087 = vmatmul.bf16.gmra.mxu3 %v1726_v35 }
  0xaa   : > { %843 = vmatmul.bf16.gmra.mxu0 %v1602_v44  ;;  %923 = vmatmul.bf16.gmra.mxu2 %v1730_v45 }
  0xab   : > { %1012 = vmatmul.bf16.gmra.mxu1 %v1606_v46  ;;  %1092 = vmatmul.bf16.gmra.mxu3 %v1734_v47  ;;  %v1625_v47 = vld [vmem:[%s2194_s23 + $0xa0] sm:$0xf] }
  0xb7   : > { %v809_v58 = vpop.f32.mrf.mxu0 }
  0xb8   : > { %v978_v62 = vpop.f32.mrf.mxu1 }
  0xb9   : > { %v979_v63 = vadd.f32 %v978_v62, %v809_v58  ;;  %v1626_v62 = vor.u32 %v1888_v48, %v1625_v47 }
  0xba   : > { %848 = vmatmul.bf16.gmra.mxu0 %v1610_v56  ;;  %928 = vmatmul.bf16.gmra.mxu2 %v1738_v57  ;;  %v1755_v56 = vld [vmem:[%s2194_s23 + $0x1a8] sm:$0xf0] }
  0xbb   : > { %v1142_v1 = vmul.f32 %v2324_v59, %v979_v63  ;;  %1017 = vmatmul.bf16.gmra.mxu1 %v1614_v60  ;;  %1097 = vmatmul.bf16.gmra.mxu3 %v1742_v61  ;;  %v1754_v63 = vor.u32 %v1920_v52, %v1753_v51 }
  0xbd   : > { %v1210_v2 = vadd.f32 %v2329_v0, %v1142_v1  ;;  %v889_v3 = vpop.f32.mrf.mxu2 }
  0xbe   : > { %v1058_v4 = vpop.f32.mrf.mxu3 }
  0xbf   : > { %v1274_v5 = vmax.f32 %v1210_v2, 0.0  ;;  %v1059_v6 = vadd.f32 %v1058_v4, %v889_v3  ;;  %v811_v7 = vpop.f32.mrf.mxu0  ;;  %v1630_v4 = vor.u32 %v1887_v53, %v1627_v54 }
  0xc0   : > { %v980_v8 = vpop.f32.mrf.mxu1 }
  0xc1   : > { %1339 = vst.msk [vmem:[%s2336_s29] sm:$0xff] %vm1338_vm0, %v1274_v5  ;;  %v1174_v9 = vmul.f32 %v2324_v59, %v1059_v6  ;;  %v981_v10 = vadd.f32 %v980_v8, %v811_v7  ;;  %v1758_v5 = vor.u32 %v1919_v55, %v1755_v56 }
  0xc3   : > { %v1242_v13 = vadd.f32 %v2329_v0, %v1174_v9  ;;  %v1143_v14 = vmul.f32 %v2324_v59, %v981_v10 }
  0xc5   : > { %v1306_v21 = vmax.f32 %v1242_v13, 0.0  ;;  %v1211_v22 = vadd.f32 %v2329_v0, %v1143_v14  ;;  %v891_v23 = vpop.f32.mrf.mxu2 }
  0xc6   : > { %v1060_v24 = vpop.f32.mrf.mxu3 }
  0xc7   : > { %1371 = vst.msk [vmem:[%s2336_s29 + $0x100] sm:$0xff] %vm1338_vm0, %v1306_v21  ;;  %v1275_v27 = vmax.f32 %v1211_v22, 0.0  ;;  %v1061_v28 = vadd.f32 %v1060_v24, %v891_v23  ;;  %v814_v29 = vpop.f32.mrf.mxu0  ;;  %v1633_v21 = vld [vmem:[%s2194_s23 + $0xb0] sm:$0xf]  ;;  %v1890_v22 = vld [vmem:[%s2194_s23 + $0xb4] sm:$0xf0] }
  0xc8   : > { %v983_v32 = vpop.f32.mrf.mxu1 }
  0xc9   : > { %1340 = vst.msk [vmem:[%s2336_s29 + $0x8] sm:$0xff] %vm1338_vm0, %v1275_v27  ;;  %v1175_v33 = vmul.f32 %v2324_v59, %v1061_v28  ;;  %v984_v34 = vadd.f32 %v983_v32, %v814_v29  ;;  %v1889_v27 = vld [vmem:[%s2194_s23 + $0xb4] sm:$0xf]  ;;  %v1635_v28 = vld [vmem:[%s2194_s23 + $0xb8] sm:$0xf0] }
  0xca   : > { %853 = vmatmul.bf16.gmra.mxu0 %v1618_v25  ;;  %933 = vmatmul.bf16.gmra.mxu2 %v1746_v26  ;;  %v1761_v25 = vld [vmem:[%s2194_s23 + $0x1b0] sm:$0xf]  ;;  %v1922_v26 = vld [vmem:[%s2194_s23 + $0x1b4] sm:$0xf0]  ;;  %v1921_v29 = vld [vmem:[%s2194_s23 + $0x1b4] sm:$0xf] }
  0xcb   : > { %v1243_v35 = vadd.f32 %v2329_v0, %v1175_v33  ;;  %v1144_v36 = vmul.f32 %v2324_v59, %v984_v34  ;;  %1022 = vmatmul.bf16.gmra.mxu1 %v1622_v30  ;;  %1102 = vmatmul.bf16.gmra.mxu3 %v1750_v31  ;;  %v1763_v30 = vld [vmem:[%s2194_s23 + $0x1b8] sm:$0xf0] }
  0xcd   : > { %v1307_v37 = vmax.f32 %v1243_v35, 0.0  ;;  %v1212_v38 = vadd.f32 %v2329_v0, %v1144_v36  ;;  %v894_v39 = vpop.f32.mrf.mxu2  ;;  %v1634_v35 = vor.u32 %v1890_v22, %v1633_v21  ;;  %v1762_v36 = vor.u32 %v1922_v26, %v1761_v25 }
  0xce   : > { %v1063_v40 = vpop.f32.mrf.mxu3 }
  0xcf   : > { %1372 = vst.msk [vmem:[%s2336_s29 + $0x108] sm:$0xff] %vm1338_vm0, %v1307_v37  ;;  %v1276_v41 = vmax.f32 %v1212_v38, 0.0  ;;  %v1064_v42 = vadd.f32 %v1063_v40, %v894_v39  ;;  %v816_v43 = vpop.f32.mrf.mxu0  ;;  %v1638_v40 = vor.u32 %v1889_v27, %v1635_v28 }
  0xd0   : > { %v985_v44 = vpop.f32.mrf.mxu1 }
  0xd1   : > { %1341 = vst.msk [vmem:[%s2336_s29 + $0x10] sm:$0xff] %vm1338_vm0, %v1276_v41  ;;  %v1176_v45 = vmul.f32 %v2324_v59, %v1064_v42  ;;  %v986_v46 = vadd.f32 %v985_v44, %v816_v43  ;;  %v1766_v41 = vor.u32 %v1921_v29, %v1763_v30 }
  0xd3   : > { %v1244_v49 = vadd.f32 %v2329_v0, %v1176_v45  ;;  %v1145_v50 = vmul.f32 %v2324_v59, %v986_v46 }
  0xd5   : > { %v1308_v57 = vmax.f32 %v1244_v49, 0.0  ;;  %v1213_v58 = vadd.f32 %v2329_v0, %v1145_v50  ;;  %v896_v60 = vpop.f32.mrf.mxu2 }
  0xd6   : > { %v1065_v61 = vpop.f32.mrf.mxu3 }
  0xd7   : > { %1373 = vst.msk [vmem:[%s2336_s29 + $0x110] sm:$0xff] %vm1338_vm0, %v1308_v57  ;;  %v1277_v1 = vmax.f32 %v1213_v58, 0.0  ;;  %v1066_v2 = vadd.f32 %v1065_v61, %v896_v60  ;;  %v819_v3 = vpop.f32.mrf.mxu0  ;;  %v1641_v57 = vld [vmem:[%s2194_s23 + $0xc0] sm:$0xf]  ;;  %v1892_v58 = vld [vmem:[%s2194_s23 + $0xc4] sm:$0xf0] }
  0xd8   : > { %v988_v6 = vpop.f32.mrf.mxu1 }
  0xd9   : > { %1342 = vst.msk [vmem:[%s2336_s29 + $0x18] sm:$0xff] %vm1338_vm0, %v1277_v1  ;;  %v1177_v7 = vmul.f32 %v2324_v59, %v1066_v2  ;;  %v989_v8 = vadd.f32 %v988_v6, %v819_v3  ;;  %v1891_v1 = vld [vmem:[%s2194_s23 + $0xc4] sm:$0xf]  ;;  %v1643_v2 = vld [vmem:[%s2194_s23 + $0xc8] sm:$0xf0] }
  0xda   : > { %858 = vmatmul.bf16.gmra.mxu0 %v1626_v62  ;;  %938 = vmatmul.bf16.gmra.mxu2 %v1754_v63  ;;  %v1769_v62 = vld [vmem:[%s2194_s23 + $0x1c0] sm:$0xf]  ;;  %v1924_v63 = vld [vmem:[%s2194_s23 + $0x1c4] sm:$0xf0]  ;;  %v1923_v3 = vld [vmem:[%s2194_s23 + $0x1c4] sm:$0xf] }
  0xdb   : > { %v1245_v9 = vadd.f32 %v2329_v0, %v1177_v7  ;;  %v1146_v10 = vmul.f32 %v2324_v59, %v989_v8  ;;  %1027 = vmatmul.bf16.gmra.mxu1 %v1630_v4  ;;  %1107 = vmatmul.bf16.gmra.mxu3 %v1758_v5  ;;  %v1771_v4 = vld [vmem:[%s2194_s23 + $0x1c8] sm:$0xf0] }
  0xdd   : > { %v1309_v11 = vmax.f32 %v1245_v9, 0.0  ;;  %v1214_v12 = vadd.f32 %v2329_v0, %v1146_v10  ;;  %v899_v13 = vpop.f32.mrf.mxu2  ;;  %v1642_v9 = vor.u32 %v1892_v58, %v1641_v57  ;;  %v1770_v10 = vor.u32 %v1924_v63, %v1769_v62 }
  0xde   : > { %v1068_v14 = vpop.f32.mrf.mxu3 }
  0xdf   : > { %1374 = vst.msk [vmem:[%s2336_s29 + $0x118] sm:$0xff] %vm1338_vm0, %v1309_v11  ;;  %v1278_v15 = vmax.f32 %v1214_v12, 0.0  ;;  %v1069_v16 = vadd.f32 %v1068_v14, %v899_v13  ;;  %v821_v17 = vpop.f32.mrf.mxu0  ;;  %v1646_v14 = vor.u32 %v1891_v1, %v1643_v2 }
  0xe0   : > { %v990_v18 = vpop.f32.mrf.mxu1 }
  0xe1   : > { %1343 = vst.msk [vmem:[%s2336_s29 + $0x20] sm:$0xff] %vm1338_vm0, %v1278_v15  ;;  %v1178_v19 = vmul.f32 %v2324_v59, %v1069_v16  ;;  %v991_v20 = vadd.f32 %v990_v18, %v821_v17  ;;  %v1774_v15 = vor.u32 %v1923_v3, %v1771_v4 }
  0xe3   : > { %v1246_v23 = vadd.f32 %v2329_v0, %v1178_v19  ;;  %v1147_v24 = vmul.f32 %v2324_v59, %v991_v20 }
  0xe5   : > { %v1310_v31 = vmax.f32 %v1246_v23, 0.0  ;;  %v1215_v32 = vadd.f32 %v2329_v0, %v1147_v24  ;;  %v901_v33 = vpop.f32.mrf.mxu2 }
  0xe6   : > { %v1070_v34 = vpop.f32.mrf.mxu3 }
  0xe7   : > { %1375 = vst.msk [vmem:[%s2336_s29 + $0x120] sm:$0xff] %vm1338_vm0, %v1310_v31  ;;  %v1279_v37 = vmax.f32 %v1215_v32, 0.0  ;;  %v1071_v38 = vadd.f32 %v1070_v34, %v901_v33  ;;  %v824_v39 = vpop.f32.mrf.mxu0  ;;  %v1649_v31 = vld [vmem:[%s2194_s23 + $0xd0] sm:$0xf]  ;;  %v1894_v32 = vld [vmem:[%s2194_s23 + $0xd4] sm:$0xf0] }
  0xe8   : > { %v993_v42 = vpop.f32.mrf.mxu1 }
  0xe9   : > { %1344 = vst.msk [vmem:[%s2336_s29 + $0x28] sm:$0xff] %vm1338_vm0, %v1279_v37  ;;  %v1179_v43 = vmul.f32 %v2324_v59, %v1071_v38  ;;  %v994_v44 = vadd.f32 %v993_v42, %v824_v39  ;;  %v1893_v37 = vld [vmem:[%s2194_s23 + $0xd4] sm:$0xf]  ;;  %v1651_v38 = vld [vmem:[%s2194_s23 + $0xd8] sm:$0xf0] }
  0xea   : > { %863 = vmatmul.bf16.gmra.mxu0 %v1634_v35  ;;  %943 = vmatmul.bf16.gmra.mxu2 %v1762_v36  ;;  %v1777_v35 = vld [vmem:[%s2194_s23 + $0x1d0] sm:$0xf]  ;;  %v1926_v36 = vld [vmem:[%s2194_s23 + $0x1d4] sm:$0xf0]  ;;  %v1925_v39 = vld [vmem:[%s2194_s23 + $0x1d4] sm:$0xf] }
  0xeb   : > { %v1247_v45 = vadd.f32 %v2329_v0, %v1179_v43  ;;  %v1148_v46 = vmul.f32 %v2324_v59, %v994_v44  ;;  %1032 = vmatmul.bf16.gmra.mxu1 %v1638_v40  ;;  %1112 = vmatmul.bf16.gmra.mxu3 %v1766_v41  ;;  %v1779_v40 = vld [vmem:[%s2194_s23 + $0x1d8] sm:$0xf0] }
  0xed   : > { %v1311_v47 = vmax.f32 %v1247_v45, 0.0  ;;  %v1216_v48 = vadd.f32 %v2329_v0, %v1148_v46  ;;  %v904_v49 = vpop.f32.mrf.mxu2  ;;  %v1650_v45 = vor.u32 %v1894_v32, %v1649_v31  ;;  %v1778_v46 = vor.u32 %v1926_v36, %v1777_v35 }
  0xee   : > { %v1073_v50 = vpop.f32.mrf.mxu3 }
  0xef   : > { %1376 = vst.msk [vmem:[%s2336_s29 + $0x128] sm:$0xff] %vm1338_vm0, %v1311_v47  ;;  %v1280_v51 = vmax.f32 %v1216_v48, 0.0  ;;  %v1074_v52 = vadd.f32 %v1073_v50, %v904_v49  ;;  %v826_v53 = vpop.f32.mrf.mxu0  ;;  %v1654_v50 = vor.u32 %v1893_v37, %v1651_v38 }
  0xf0   : > { %v995_v54 = vpop.f32.mrf.mxu1 }
  0xf1   : > { %1345 = vst.msk [vmem:[%s2336_s29 + $0x30] sm:$0xff] %vm1338_vm0, %v1280_v51  ;;  %v1180_v55 = vmul.f32 %v2324_v59, %v1074_v52  ;;  %v996_v56 = vadd.f32 %v995_v54, %v826_v53  ;;  %v1782_v51 = vor.u32 %v1925_v39, %v1779_v40 }
  0xf3   : > { %v1248_v60 = vadd.f32 %v2329_v0, %v1180_v55  ;;  %v1149_v61 = vmul.f32 %v2324_v59, %v996_v56 }
  0xf5   : > { %v1312_v5 = vmax.f32 %v1248_v60, 0.0  ;;  %v1217_v6 = vadd.f32 %v2329_v0, %v1149_v61  ;;  %v906_v7 = vpop.f32.mrf.mxu2 }
  0xf6   : > { %v1075_v8 = vpop.f32.mrf.mxu3 }
  0xf7   : > { %1377 = vst.msk [vmem:[%s2336_s29 + $0x130] sm:$0xff] %vm1338_vm0, %v1312_v5  ;;  %v1281_v11 = vmax.f32 %v1217_v6, 0.0  ;;  %v1076_v12 = vadd.f32 %v1075_v8, %v906_v7  ;;  %v829_v13 = vpop.f32.mrf.mxu0  ;;  %v1657_v5 = vld [vmem:[%s2194_s23 + $0xe0] sm:$0xf]  ;;  %v1896_v6 = vld [vmem:[%s2194_s23 + $0xe4] sm:$0xf0] }
  0xf8   : > { %v998_v16 = vpop.f32.mrf.mxu1 }
  0xf9   : > { %1346 = vst.msk [vmem:[%s2336_s29 + $0x38] sm:$0xff] %vm1338_vm0, %v1281_v11  ;;  %v1181_v17 = vmul.f32 %v2324_v59, %v1076_v12  ;;  %v999_v18 = vadd.f32 %v998_v16, %v829_v13  ;;  %v1895_v11 = vld [vmem:[%s2194_s23 + $0xe4] sm:$0xf]  ;;  %v1659_v12 = vld [vmem:[%s2194_s23 + $0xe8] sm:$0xf0] }
  0xfa   : > { %868 = vmatmul.bf16.gmra.mxu0 %v1642_v9  ;;  %948 = vmatmul.bf16.gmra.mxu2 %v1770_v10  ;;  %v1785_v9 = vld [vmem:[%s2194_s23 + $0x1e0] sm:$0xf]  ;;  %v1928_v10 = vld [vmem:[%s2194_s23 + $0x1e4] sm:$0xf0]  ;;  %v1927_v13 = vld [vmem:[%s2194_s23 + $0x1e4] sm:$0xf] }
  0xfb   : > { %v1249_v19 = vadd.f32 %v2329_v0, %v1181_v17  ;;  %v1150_v20 = vmul.f32 %v2324_v59, %v999_v18  ;;  %1037 = vmatmul.bf16.gmra.mxu1 %v1646_v14  ;;  %1117 = vmatmul.bf16.gmra.mxu3 %v1774_v15  ;;  %v1787_v14 = vld [vmem:[%s2194_s23 + $0x1e8] sm:$0xf0] }
  0xfd   : > { %v1313_v21 = vmax.f32 %v1249_v19, 0.0  ;;  %v1218_v22 = vadd.f32 %v2329_v0, %v1150_v20  ;;  %v909_v23 = vpop.f32.mrf.mxu2  ;;  %v1658_v19 = vor.u32 %v1896_v6, %v1657_v5  ;;  %v1786_v20 = vor.u32 %v1928_v10, %v1785_v9 }
  0xfe   : > { %v1078_v24 = vpop.f32.mrf.mxu3 }
  0xff   : > { %1378 = vst.msk [vmem:[%s2336_s29 + $0x138] sm:$0xff] %vm1338_vm0, %v1313_v21  ;;  %v1282_v25 = vmax.f32 %v1218_v22, 0.0  ;;  %v1079_v26 = vadd.f32 %v1078_v24, %v909_v23  ;;  %v831_v27 = vpop.f32.mrf.mxu0  ;;  %v1662_v24 = vor.u32 %v1895_v11, %v1659_v12 }
 0x100   : > { %v1000_v28 = vpop.f32.mrf.mxu1 }
 0x101   : > { %1347 = vst.msk [vmem:[%s2336_s29 + $0x40] sm:$0xff] %vm1338_vm0, %v1282_v25  ;;  %v1182_v29 = vmul.f32 %v2324_v59, %v1079_v26  ;;  %v1001_v30 = vadd.f32 %v1000_v28, %v831_v27  ;;  %v1790_v25 = vor.u32 %v1927_v13, %v1787_v14 }
 0x103   : > { %v1250_v33 = vadd.f32 %v2329_v0, %v1182_v29  ;;  %v1151_v34 = vmul.f32 %v2324_v59, %v1001_v30 }
 0x105   : > { %v1314_v41 = vmax.f32 %v1250_v33, 0.0  ;;  %v1219_v42 = vadd.f32 %v2329_v0, %v1151_v34  ;;  %v911_v43 = vpop.f32.mrf.mxu2 }
 0x106   : > { %v1080_v44 = vpop.f32.mrf.mxu3 }
 0x107   : > { %1379 = vst.msk [vmem:[%s2336_s29 + $0x140] sm:$0xff] %vm1338_vm0, %v1314_v41  ;;  %v1283_v47 = vmax.f32 %v1219_v42, 0.0  ;;  %v1081_v48 = vadd.f32 %v1080_v44, %v911_v43  ;;  %v834_v49 = vpop.f32.mrf.mxu0  ;;  %v1665_v41 = vld [vmem:[%s2194_s23 + $0xf0] sm:$0xf]  ;;  %v1898_v42 = vld [vmem:[%s2194_s23 + $0xf4] sm:$0xf0] }
 0x108   : > { %v1003_v52 = vpop.f32.mrf.mxu1 }
 0x109   : > { %1348 = vst.msk [vmem:[%s2336_s29 + $0x48] sm:$0xff] %vm1338_vm0, %v1283_v47  ;;  %v1183_v53 = vmul.f32 %v2324_v59, %v1081_v48  ;;  %v1004_v54 = vadd.f32 %v1003_v52, %v834_v49  ;;  %v1897_v47 = vld [vmem:[%s2194_s23 + $0xf4] sm:$0xf]  ;;  %v1667_v48 = vld [vmem:[%s2194_s23 + $0xf8] sm:$0xf0] }
 0x10a   : > { %873 = vmatmul.bf16.gmra.mxu0 %v1650_v45  ;;  %953 = vmatmul.bf16.gmra.mxu2 %v1778_v46  ;;  %v1793_v45 = vld [vmem:[%s2194_s23 + $0x1f0] sm:$0xf]  ;;  %v1930_v46 = vld [vmem:[%s2194_s23 + $0x1f4] sm:$0xf0]  ;;  %v1929_v49 = vld [vmem:[%s2194_s23 + $0x1f4] sm:$0xf] }
 0x10b   : > { %v1251_v55 = vadd.f32 %v2329_v0, %v1183_v53  ;;  %v1152_v56 = vmul.f32 %v2324_v59, %v1004_v54  ;;  %1042 = vmatmul.bf16.gmra.mxu1 %v1654_v50  ;;  %1122 = vmatmul.bf16.gmra.mxu3 %v1782_v51  ;;  %v1795_v50 = vld [vmem:[%s2194_s23 + $0x1f8] sm:$0xf0] }
 0x10d   : > { %v1315_v57 = vmax.f32 %v1251_v55, 0.0  ;;  %v1220_v58 = vadd.f32 %v2329_v0, %v1152_v56  ;;  %v914_v60 = vpop.f32.mrf.mxu2  ;;  %v1666_v55 = vor.u32 %v1898_v42, %v1665_v41  ;;  %v1794_v56 = vor.u32 %v1930_v46, %v1793_v45 }
 0x10e   : > { %v1083_v61 = vpop.f32.mrf.mxu3 }
 0x10f   : > { %1380 = vst.msk [vmem:[%s2336_s29 + $0x148] sm:$0xff] %vm1338_vm0, %v1315_v57  ;;  %v1284_v62 = vmax.f32 %v1220_v58, 0.0  ;;  %v1084_v63 = vadd.f32 %v1083_v61, %v914_v60  ;;  %v836_v1 = vpop.f32.mrf.mxu0  ;;  %v1670_v61 = vor.u32 %v1897_v47, %v1667_v48 }
 0x110   : > { %v1005_v2 = vpop.f32.mrf.mxu1 }
 0x111   : > { %1349 = vst.msk [vmem:[%s2336_s29 + $0x50] sm:$0xff] %vm1338_vm0, %v1284_v62  ;;  %v1184_v3 = vmul.f32 %v2324_v59, %v1084_v63  ;;  %v1006_v4 = vadd.f32 %v1005_v2, %v836_v1  ;;  %v1798_v62 = vor.u32 %v1929_v49, %v1795_v50 }
 0x113   : > { %v1252_v7 = vadd.f32 %v2329_v0, %v1184_v3  ;;  %v1153_v8 = vmul.f32 %v2324_v59, %v1006_v4 }
 0x115   : > { %v1316_v15 = vmax.f32 %v1252_v7, 0.0  ;;  %v1221_v16 = vadd.f32 %v2329_v0, %v1153_v8  ;;  %v916_v17 = vpop.f32.mrf.mxu2 }
 0x116   : > { %v1085_v18 = vpop.f32.mrf.mxu3 }
 0x117   : > { %1381 = vst.msk [vmem:[%s2336_s29 + $0x150] sm:$0xff] %vm1338_vm0, %v1316_v15  ;;  %v1285_v21 = vmax.f32 %v1221_v16, 0.0  ;;  %v1086_v22 = vadd.f32 %v1085_v18, %v916_v17  ;;  %v839_v23 = vpop.f32.mrf.mxu0 }
 0x118   : > { %v1008_v26 = vpop.f32.mrf.mxu1 }
 0x119   : > { %1350 = vst.msk [vmem:[%s2336_s29 + $0x58] sm:$0xff] %vm1338_vm0, %v1285_v21  ;;  %v1185_v27 = vmul.f32 %v2324_v59, %v1086_v22  ;;  %v1009_v28 = vadd.f32 %v1008_v26, %v839_v23 }
 0x11a   : > { %878 = vmatmul.bf16.gmra.mxu0 %v1658_v19  ;;  %958 = vmatmul.bf16.gmra.mxu2 %v1786_v20 }
 0x11b   : > { %v1253_v29 = vadd.f32 %v2329_v0, %v1185_v27  ;;  %v1154_v30 = vmul.f32 %v2324_v59, %v1009_v28  ;;  %1047 = vmatmul.bf16.gmra.mxu1 %v1662_v24  ;;  %1127 = vmatmul.bf16.gmra.mxu3 %v1790_v25 }
 0x11d   : > { %v1317_v31 = vmax.f32 %v1253_v29, 0.0  ;;  %v1222_v32 = vadd.f32 %v2329_v0, %v1154_v30  ;;  %v919_v33 = vpop.f32.mrf.mxu2 }
 0x11e   : > { %v1088_v34 = vpop.f32.mrf.mxu3 }
 0x11f   : > { %1382 = vst.msk [vmem:[%s2336_s29 + $0x158] sm:$0xff] %vm1338_vm0, %v1317_v31  ;;  %v1286_v35 = vmax.f32 %v1222_v32, 0.0  ;;  %v1089_v36 = vadd.f32 %v1088_v34, %v919_v33  ;;  %v841_v37 = vpop.f32.mrf.mxu0 }
 0x120   : > { %v1010_v38 = vpop.f32.mrf.mxu1 }
 0x121   : > { %1351 = vst.msk [vmem:[%s2336_s29 + $0x60] sm:$0xff] %vm1338_vm0, %v1286_v35  ;;  %v1186_v39 = vmul.f32 %v2324_v59, %v1089_v36  ;;  %v1011_v40 = vadd.f32 %v1010_v38, %v841_v37 }
 0x123   : > { %v1254_v43 = vadd.f32 %v2329_v0, %v1186_v39  ;;  %v1155_v44 = vmul.f32 %v2324_v59, %v1011_v40 }
 0x125   : > { %v1318_v51 = vmax.f32 %v1254_v43, 0.0  ;;  %v1223_v52 = vadd.f32 %v2329_v0, %v1155_v44  ;;  %v921_v53 = vpop.f32.mrf.mxu2 }
 0x126   : > { %v1090_v54 = vpop.f32.mrf.mxu3 }
 0x127   : > { %1383 = vst.msk [vmem:[%s2336_s29 + $0x160] sm:$0xff] %vm1338_vm0, %v1318_v51  ;;  %v1287_v57 = vmax.f32 %v1223_v52, 0.0  ;;  %v1091_v58 = vadd.f32 %v1090_v54, %v921_v53  ;;  %v844_v60 = vpop.f32.mrf.mxu0 }
 0x128   : > { %v1013_v63 = vpop.f32.mrf.mxu1 }
 0x129   : > { %1352 = vst.msk [vmem:[%s2336_s29 + $0x68] sm:$0xff] %vm1338_vm0, %v1287_v57  ;;  %v1187_v1 = vmul.f32 %v2324_v59, %v1091_v58  ;;  %v1014_v2 = vadd.f32 %v1013_v63, %v844_v60 }
 0x12a   : > { %883 = vmatmul.bf16.gmra.mxu0 %v1666_v55  ;;  %963 = vmatmul.bf16.gmra.mxu2 %v1794_v56 }
 0x12b   : > { %v1255_v3 = vadd.f32 %v2329_v0, %v1187_v1  ;;  %v1156_v4 = vmul.f32 %v2324_v59, %v1014_v2  ;;  %1052 = vmatmul.bf16.gmra.mxu1 %v1670_v61  ;;  %1132 = vmatmul.bf16.gmra.mxu3 %v1798_v62 }
 0x12d   : > { %v1319_v5 = vmax.f32 %v1255_v3, 0.0  ;;  %v1224_v6 = vadd.f32 %v2329_v0, %v1156_v4  ;;  %v924_v7 = vpop.f32.mrf.mxu2 }
 0x12e   : > { %v1093_v8 = vpop.f32.mrf.mxu3 }
 0x12f   : > { %1384 = vst.msk [vmem:[%s2336_s29 + $0x168] sm:$0xff] %vm1338_vm0, %v1319_v5  ;;  %v1288_v9 = vmax.f32 %v1224_v6, 0.0  ;;  %v1094_v10 = vadd.f32 %v1093_v8, %v924_v7  ;;  %v846_v11 = vpop.f32.mrf.mxu0 }
 0x130   : > { %v1015_v12 = vpop.f32.mrf.mxu1 }
 0x131   : > { %1353 = vst.msk [vmem:[%s2336_s29 + $0x70] sm:$0xff] %vm1338_vm0, %v1288_v9  ;;  %v1188_v13 = vmul.f32 %v2324_v59, %v1094_v10  ;;  %v1016_v14 = vadd.f32 %v1015_v12, %v846_v11 }
 0x133   : > { %v1256_v15 = vadd.f32 %v2329_v0, %v1188_v13  ;;  %v1157_v16 = vmul.f32 %v2324_v59, %v1016_v14 }
 0x135   : > { %v1320_v17 = vmax.f32 %v1256_v15, 0.0  ;;  %v1225_v18 = vadd.f32 %v2329_v0, %v1157_v16  ;;  %v926_v19 = vpop.f32.mrf.mxu2 }
 0x136   : > { %v1095_v20 = vpop.f32.mrf.mxu3 }
 0x137   : > { %1385 = vst.msk [vmem:[%s2336_s29 + $0x170] sm:$0xff] %vm1338_vm0, %v1320_v17  ;;  %v1289_v21 = vmax.f32 %v1225_v18, 0.0  ;;  %v1096_v22 = vadd.f32 %v1095_v20, %v926_v19  ;;  %v849_v23 = vpop.f32.mrf.mxu0 }
 0x138   : > { %v1018_v24 = vpop.f32.mrf.mxu1 }
 0x139   : > { %1354 = vst.msk [vmem:[%s2336_s29 + $0x78] sm:$0xff] %vm1338_vm0, %v1289_v21  ;;  %v1189_v25 = vmul.f32 %v2324_v59, %v1096_v22  ;;  %v1019_v26 = vadd.f32 %v1018_v24, %v849_v23 }
 0x13b   : > { %v1257_v27 = vadd.f32 %v2329_v0, %v1189_v25  ;;  %v1158_v28 = vmul.f32 %v2324_v59, %v1019_v26 }
 0x13d   : > { %v1321_v29 = vmax.f32 %v1257_v27, 0.0  ;;  %v1226_v30 = vadd.f32 %v2329_v0, %v1158_v28  ;;  %v929_v31 = vpop.f32.mrf.mxu2 }
 0x13e   : > { %v1098_v32 = vpop.f32.mrf.mxu3 }
 0x13f   : > { %1386 = vst.msk [vmem:[%s2336_s29 + $0x178] sm:$0xff] %vm1338_vm0, %v1321_v29  ;;  %v1290_v33 = vmax.f32 %v1226_v30, 0.0  ;;  %v1099_v34 = vadd.f32 %v1098_v32, %v929_v31  ;;  %v851_v35 = vpop.f32.mrf.mxu0 }
 0x140   : > { %v1020_v36 = vpop.f32.mrf.mxu1 }
 0x141   : > { %1355 = vst.msk [vmem:[%s2336_s29 + $0x80] sm:$0xff] %vm1338_vm0, %v1290_v33  ;;  %v1190_v37 = vmul.f32 %v2324_v59, %v1099_v34  ;;  %v1021_v38 = vadd.f32 %v1020_v36, %v851_v35 }
 0x143   : > { %v1258_v39 = vadd.f32 %v2329_v0, %v1190_v37  ;;  %v1159_v40 = vmul.f32 %v2324_v59, %v1021_v38 }
 0x145   : > { %v1322_v41 = vmax.f32 %v1258_v39, 0.0  ;;  %v1227_v42 = vadd.f32 %v2329_v0, %v1159_v40  ;;  %v931_v43 = vpop.f32.mrf.mxu2 }
 0x146   : > { %v1100_v44 = vpop.f32.mrf.mxu3 }
 0x147   : > { %1387 = vst.msk [vmem:[%s2336_s29 + $0x180] sm:$0xff] %vm1338_vm0, %v1322_v41  ;;  %v1291_v45 = vmax.f32 %v1227_v42, 0.0  ;;  %v1101_v46 = vadd.f32 %v1100_v44, %v931_v43  ;;  %v854_v47 = vpop.f32.mrf.mxu0 }
 0x148   : > { %v1023_v48 = vpop.f32.mrf.mxu1 }
 0x149   : > { %1356 = vst.msk [vmem:[%s2336_s29 + $0x88] sm:$0xff] %vm1338_vm0, %v1291_v45  ;;  %v1191_v49 = vmul.f32 %v2324_v59, %v1101_v46  ;;  %v1024_v50 = vadd.f32 %v1023_v48, %v854_v47 }
 0x14b   : > { %v1259_v51 = vadd.f32 %v2329_v0, %v1191_v49  ;;  %v1160_v52 = vmul.f32 %v2324_v59, %v1024_v50 }
 0x14d   : > { %v1323_v53 = vmax.f32 %v1259_v51, 0.0  ;;  %v1228_v54 = vadd.f32 %v2329_v0, %v1160_v52  ;;  %v934_v55 = vpop.f32.mrf.mxu2 }
 0x14e   : > { %v1103_v56 = vpop.f32.mrf.mxu3 }
 0x14f   : > { %1388 = vst.msk [vmem:[%s2336_s29 + $0x188] sm:$0xff] %vm1338_vm0, %v1323_v53  ;;  %v1292_v57 = vmax.f32 %v1228_v54, 0.0  ;;  %v1104_v58 = vadd.f32 %v1103_v56, %v934_v55  ;;  %v856_v60 = vpop.f32.mrf.mxu0 }
 0x150   : > { %v1025_v61 = vpop.f32.mrf.mxu1 }
 0x151   : > { %1357 = vst.msk [vmem:[%s2336_s29 + $0x90] sm:$0xff] %vm1338_vm0, %v1292_v57  ;;  %v1192_v62 = vmul.f32 %v2324_v59, %v1104_v58  ;;  %v1026_v63 = vadd.f32 %v1025_v61, %v856_v60 }
 0x153   : > { %v1260_v1 = vadd.f32 %v2329_v0, %v1192_v62  ;;  %v1161_v2 = vmul.f32 %v2324_v59, %v1026_v63 }
 0x155   : > { %v1324_v3 = vmax.f32 %v1260_v1, 0.0  ;;  %v1229_v4 = vadd.f32 %v2329_v0, %v1161_v2  ;;  %v936_v5 = vpop.f32.mrf.mxu2 }
 0x156   : > { %v1105_v6 = vpop.f32.mrf.mxu3 }
 0x157   : > { %1389 = vst.msk [vmem:[%s2336_s29 + $0x190] sm:$0xff] %vm1338_vm0, %v1324_v3  ;;  %v1293_v7 = vmax.f32 %v1229_v4, 0.0  ;;  %v1106_v8 = vadd.f32 %v1105_v6, %v936_v5  ;;  %v859_v9 = vpop.f32.mrf.mxu0 }
 0x158   : > { %v1028_v10 = vpop.f32.mrf.mxu1 }
 0x159   : > { %1358 = vst.msk [vmem:[%s2336_s29 + $0x98] sm:$0xff] %vm1338_vm0, %v1293_v7  ;;  %v1193_v11 = vmul.f32 %v2324_v59, %v1106_v8  ;;  %v1029_v12 = vadd.f32 %v1028_v10, %v859_v9 }
 0x15b   : > { %v1261_v13 = vadd.f32 %v2329_v0, %v1193_v11  ;;  %v1162_v14 = vmul.f32 %v2324_v59, %v1029_v12 }
 0x15d   : > { %v1325_v15 = vmax.f32 %v1261_v13, 0.0  ;;  %v1230_v16 = vadd.f32 %v2329_v0, %v1162_v14  ;;  %v939_v17 = vpop.f32.mrf.mxu2 }
 0x15e   : > { %v1108_v18 = vpop.f32.mrf.mxu3 }
 0x15f   : > { %1390 = vst.msk [vmem:[%s2336_s29 + $0x198] sm:$0xff] %vm1338_vm0, %v1325_v15  ;;  %v1294_v19 = vmax.f32 %v1230_v16, 0.0  ;;  %v1109_v20 = vadd.f32 %v1108_v18, %v939_v17  ;;  %v861_v21 = vpop.f32.mrf.mxu0 }
 0x160   : > { %v1030_v22 = vpop.f32.mrf.mxu1 }
 0x161   : > { %1359 = vst.msk [vmem:[%s2336_s29 + $0xa0] sm:$0xff] %vm1338_vm0, %v1294_v19  ;;  %v1194_v23 = vmul.f32 %v2324_v59, %v1109_v20  ;;  %v1031_v24 = vadd.f32 %v1030_v22, %v861_v21 }
 0x163   : > { %v1262_v25 = vadd.f32 %v2329_v0, %v1194_v23  ;;  %v1163_v26 = vmul.f32 %v2324_v59, %v1031_v24 }
 0x165   : > { %v1326_v27 = vmax.f32 %v1262_v25, 0.0  ;;  %v1231_v28 = vadd.f32 %v2329_v0, %v1163_v26  ;;  %v941_v29 = vpop.f32.mrf.mxu2 }
 0x166   : > { %v1110_v30 = vpop.f32.mrf.mxu3 }
 0x167   : > { %1391 = vst.msk [vmem:[%s2336_s29 + $0x1a0] sm:$0xff] %vm1338_vm0, %v1326_v27  ;;  %v1295_v31 = vmax.f32 %v1231_v28, 0.0  ;;  %v1111_v32 = vadd.f32 %v1110_v30, %v941_v29  ;;  %v864_v33 = vpop.f32.mrf.mxu0 }
 0x168   : > { %v1033_v34 = vpop.f32.mrf.mxu1 }
 0x169   : > { %1360 = vst.msk [vmem:[%s2336_s29 + $0xa8] sm:$0xff] %vm1338_vm0, %v1295_v31  ;;  %v1195_v35 = vmul.f32 %v2324_v59, %v1111_v32  ;;  %v1034_v36 = vadd.f32 %v1033_v34, %v864_v33 }
 0x16b   : > { %v1263_v37 = vadd.f32 %v2329_v0, %v1195_v35  ;;  %v1164_v38 = vmul.f32 %v2324_v59, %v1034_v36 }
 0x16d   : > { %v1327_v39 = vmax.f32 %v1263_v37, 0.0  ;;  %v1232_v40 = vadd.f32 %v2329_v0, %v1164_v38  ;;  %v944_v41 = vpop.f32.mrf.mxu2 }
 0x16e   : > { %v1113_v42 = vpop.f32.mrf.mxu3 }
 0x16f   : > { %1392 = vst.msk [vmem:[%s2336_s29 + $0x1a8] sm:$0xff] %vm1338_vm0, %v1327_v39  ;;  %v1296_v43 = vmax.f32 %v1232_v40, 0.0  ;;  %v1114_v44 = vadd.f32 %v1113_v42, %v944_v41  ;;  %v866_v45 = vpop.f32.mrf.mxu0 }
 0x170   : > { %v1035_v46 = vpop.f32.mrf.mxu1 }
 0x171   : > { %1361 = vst.msk [vmem:[%s2336_s29 + $0xb0] sm:$0xff] %vm1338_vm0, %v1296_v43  ;;  %v1196_v47 = vmul.f32 %v2324_v59, %v1114_v44  ;;  %v1036_v48 = vadd.f32 %v1035_v46, %v866_v45  ;;  %v2022_v45 = vld [vmem:[%s2657_s2] ss:$0 sm:$0xff] }
 0x173   : > { %v1264_v49 = vadd.f32 %v2329_v0, %v1196_v47  ;;  %v1165_v50 = vmul.f32 %v2324_v59, %v1036_v48 }
 0x175   : > { %v1328_v51 = vmax.f32 %v1264_v49, 0.0  ;;  %v1233_v52 = vadd.f32 %v2329_v0, %v1165_v50  ;;  %v946_v53 = vpop.f32.mrf.mxu2  ;;  %v2023_v50 = vld [vmem:[%s2658_s3] ss:$0 sm:$0xff] }
 0x176   : > { %v1115_v54 = vpop.f32.mrf.mxu3 }
 0x177   : > { %1393 = vst.msk [vmem:[%s2336_s29 + $0x1b0] sm:$0xff] %vm1338_vm0, %v1328_v51  ;;  %v1297_v55 = vmax.f32 %v1233_v52, 0.0  ;;  %v1116_v56 = vadd.f32 %v1115_v54, %v946_v53  ;;  %v869_v57 = vpop.f32.mrf.mxu0 }
 0x178   : > { %v1038_v58 = vpop.f32.mrf.mxu1 }
 0x179   : > { %1362 = vst.msk [vmem:[%s2336_s29 + $0xb8] sm:$0xff] %vm1338_vm0, %v1297_v55  ;;  %v1197_v60 = vmul.f32 %v2324_v59, %v1116_v56  ;;  %v1039_v61 = vadd.f32 %v1038_v58, %v869_v57 }
 0x17b   : > { %v1265_v62 = vadd.f32 %v2329_v0, %v1197_v60  ;;  %v1166_v63 = vmul.f32 %v2324_v59, %v1039_v61 }
 0x17d   : > { %v1329_v1 = vmax.f32 %v1265_v62, 0.0  ;;  %v1234_v2 = vadd.f32 %v2329_v0, %v1166_v63  ;;  %v949_v3 = vpop.f32.mrf.mxu2 }
 0x17e   : > { %v1118_v4 = vpop.f32.mrf.mxu3 }
 0x17f   : > { %1394 = vst.msk [vmem:[%s2336_s29 + $0x1b8] sm:$0xff] %vm1338_vm0, %v1329_v1  ;;  %v1298_v5 = vmax.f32 %v1234_v2, 0.0  ;;  %v1119_v6 = vadd.f32 %v1118_v4, %v949_v3  ;;  %v871_v7 = vpop.f32.mrf.mxu0 }
 0x180   : > { %v1040_v8 = vpop.f32.mrf.mxu1 }
 0x181   : > { %1363 = vst.msk [vmem:[%s2336_s29 + $0xc0] sm:$0xff] %vm1338_vm0, %v1298_v5  ;;  %v1198_v9 = vmul.f32 %v2324_v59, %v1119_v6  ;;  %v1041_v10 = vadd.f32 %v1040_v8, %v871_v7 }
 0x183   : > { %v1266_v11 = vadd.f32 %v2329_v0, %v1198_v9  ;;  %v1167_v12 = vmul.f32 %v2324_v59, %v1041_v10 }
 0x185   : > { %v1330_v13 = vmax.f32 %v1266_v11, 0.0  ;;  %v1235_v14 = vadd.f32 %v2329_v0, %v1167_v12  ;;  %v951_v15 = vpop.f32.mrf.mxu2 }
 0x186   : > { %v1120_v16 = vpop.f32.mrf.mxu3 }
 0x187   : > { %1395 = vst.msk [vmem:[%s2336_s29 + $0x1c0] sm:$0xff] %vm1338_vm0, %v1330_v13  ;;  %v1299_v17 = vmax.f32 %v1235_v14, 0.0  ;;  %v1121_v18 = vadd.f32 %v1120_v16, %v951_v15  ;;  %v874_v19 = vpop.f32.mrf.mxu0 }
 0x188   : > { %v1043_v20 = vpop.f32.mrf.mxu1 }
 0x189   : > { %1364 = vst.msk [vmem:[%s2336_s29 + $0xc8] sm:$0xff] %vm1338_vm0, %v1299_v17  ;;  %v1199_v21 = vmul.f32 %v2324_v59, %v1121_v18  ;;  %v1044_v22 = vadd.f32 %v1043_v20, %v874_v19 }
 0x18b   : > { %v1267_v23 = vadd.f32 %v2329_v0, %v1199_v21  ;;  %v1168_v24 = vmul.f32 %v2324_v59, %v1044_v22 }
 0x18d   : > { %v1331_v25 = vmax.f32 %v1267_v23, 0.0  ;;  %v1236_v26 = vadd.f32 %v2329_v0, %v1168_v24  ;;  %v954_v27 = vpop.f32.mrf.mxu2 }
 0x18e   : > { %v1123_v28 = vpop.f32.mrf.mxu3 }
 0x18f   : > { %1396 = vst.msk [vmem:[%s2336_s29 + $0x1c8] sm:$0xff] %vm1338_vm0, %v1331_v25  ;;  %v1300_v29 = vmax.f32 %v1236_v26, 0.0  ;;  %v1124_v30 = vadd.f32 %v1123_v28, %v954_v27  ;;  %v876_v31 = vpop.f32.mrf.mxu0 }
 0x190   : > { %v1045_v32 = vpop.f32.mrf.mxu1 }
 0x191   : > { %1365 = vst.msk [vmem:[%s2336_s29 + $0xd0] sm:$0xff] %vm1338_vm0, %v1300_v29  ;;  %v1200_v33 = vmul.f32 %v2324_v59, %v1124_v30  ;;  %v1046_v34 = vadd.f32 %v1045_v32, %v876_v31 }
 0x193   : > { %v1268_v35 = vadd.f32 %v2329_v0, %v1200_v33  ;;  %v1169_v36 = vmul.f32 %v2324_v59, %v1046_v34 }
 0x195   : > { %v1332_v37 = vmax.f32 %v1268_v35, 0.0  ;;  %v1237_v38 = vadd.f32 %v2329_v0, %v1169_v36  ;;  %v956_v39 = vpop.f32.mrf.mxu2 }
 0x196   : > { %v1125_v40 = vpop.f32.mrf.mxu3 }
 0x197   : > { %1397 = vst.msk [vmem:[%s2336_s29 + $0x1d0] sm:$0xff] %vm1338_vm0, %v1332_v37  ;;  %v1301_v41 = vmax.f32 %v1237_v38, 0.0  ;;  %v1126_v42 = vadd.f32 %v1125_v40, %v956_v39  ;;  %v879_v43 = vpop.f32.mrf.mxu0 }
 0x198   : > { %v1048_v44 = vpop.f32.mrf.mxu1 }
 0x199   : > { %1366 = vst.msk [vmem:[%s2336_s29 + $0xd8] sm:$0xff] %vm1338_vm0, %v1301_v41  ;;  %v1201_v59 = vmul.f32 %v2022_v45, %v1126_v42  ;;  %v1049_v46 = vadd.f32 %v1048_v44, %v879_v43 }
 0x19b   : > { %v1269_v47 = vadd.f32 %v2329_v0, %v1201_v59  ;;  %v1170_v48 = vmul.f32 %v2022_v45, %v1049_v46 }
 0x19d   : > { %v1333_v49 = vmax.f32 %v1269_v47, 0.0  ;;  %v1238_v51 = vadd.f32 %v2023_v50, %v1170_v48  ;;  %v959_v52 = vpop.f32.mrf.mxu2 }
 0x19e   : > { %v1128_v53 = vpop.f32.mrf.mxu3 }
 0x19f   : > { %1398 = vst.msk [vmem:[%s2336_s29 + $0x1d8] sm:$0xff] %vm1338_vm0, %v1333_v49  ;;  %v1302_v54 = vmax.f32 %v1238_v51, 0.0  ;;  %v1129_v55 = vadd.f32 %v1128_v53, %v959_v52  ;;  %v881_v56 = vpop.f32.mrf.mxu0 }
 0x1a0   : > { %v1050_v57 = vpop.f32.mrf.mxu1 }
 0x1a1   : > { %1367 = vst.msk [vmem:[%s2336_s29 + $0xe0] sm:$0xff] %vm1338_vm0, %v1302_v54  ;;  %v1202_v0 = vmul.f32 %v2022_v45, %v1129_v55  ;;  %v1051_v58 = vadd.f32 %v1050_v57, %v881_v56 }
 0x1a3   : > { %v1270_v60 = vadd.f32 %v2023_v50, %v1202_v0  ;;  %v1171_v61 = vmul.f32 %v2022_v45, %v1051_v58 }
 0x1a5   : > { %v1334_v62 = vmax.f32 %v1270_v60, 0.0  ;;  %v1239_v63 = vadd.f32 %v2023_v50, %v1171_v61  ;;  %v961_v1 = vpop.f32.mrf.mxu2 }
 0x1a6   : > { %v1130_v2 = vpop.f32.mrf.mxu3 }
 0x1a7   : > { %1399 = vst.msk [vmem:[%s2336_s29 + $0x1e0] sm:$0xff] %vm1338_vm0, %v1334_v62  ;;  %v1303_v3 = vmax.f32 %v1239_v63, 0.0  ;;  %v1131_v4 = vadd.f32 %v1130_v2, %v961_v1  ;;  %v884_v5 = vpop.f32.mrf.mxu0 }
 0x1a8   : > { %v1053_v6 = vpop.f32.mrf.mxu1 }
 0x1a9   : > { %1368 = vst.msk [vmem:[%s2336_s29 + $0xe8] sm:$0xff] %vm1338_vm0, %v1303_v3  ;;  %v1203_v7 = vmul.f32 %v2022_v45, %v1131_v4  ;;  %v1054_v8 = vadd.f32 %v1053_v6, %v884_v5 }
 0x1ab   : > { %v1271_v9 = vadd.f32 %v2023_v50, %v1203_v7  ;;  %v1172_v10 = vmul.f32 %v2022_v45, %v1054_v8 }
 0x1ad   : > { %v1335_v11 = vmax.f32 %v1271_v9, 0.0  ;;  %v1240_v12 = vadd.f32 %v2023_v50, %v1172_v10  ;;  %v964_v13 = vpop.f32.mrf.mxu2 }
 0x1ae   : > { %v1133_v14 = vpop.f32.mrf.mxu3 }
 0x1af   : > { %1400 = vst.msk [vmem:[%s2336_s29 + $0x1e8] sm:$0xff] %vm1338_vm0, %v1335_v11  ;;  %v1304_v15 = vmax.f32 %v1240_v12, 0.0  ;;  %v1134_v16 = vadd.f32 %v1133_v14, %v964_v13  ;;  %v886_v17 = vpop.f32.mrf.mxu0 }
 0x1b0   : > { %v1055_v18 = vpop.f32.mrf.mxu1 }
 0x1b1   : > { %1369 = vst.msk [vmem:[%s2336_s29 + $0xf0] sm:$0xff] %vm1338_vm0, %v1304_v15  ;;  %v1204_v19 = vmul.f32 %v2022_v45, %v1134_v16  ;;  %v1056_v20 = vadd.f32 %v1055_v18, %v886_v17 }
 0x1b3   : > { %v1272_v21 = vadd.f32 %v2023_v50, %v1204_v19  ;;  %v1173_v22 = vmul.f32 %v2022_v45, %v1056_v20 }
 0x1b5   : > { %v1336_v23 = vmax.f32 %v1272_v21, 0.0  ;;  %v1241_v24 = vadd.f32 %v2023_v50, %v1173_v22  ;;  %v966_v25 = vpop.f32.mrf.mxu2 }
 0x1b6   : > { %v1135_v26 = vpop.f32.mrf.mxu3 }
 0x1b7   : > { %1401 = vst.msk [vmem:[%s2336_s29 + $0x1f0] sm:$0xff] %vm1338_vm0, %v1336_v23  ;;  %v1305_v27 = vmax.f32 %v1241_v24, 0.0  ;;  %v1136_v28 = vadd.f32 %v1135_v26, %v966_v25 }
 0x1b9   : > { %1370 = vst.msk [vmem:[%s2336_s29 + $0xf8] sm:$0xff] %vm1338_vm0, %v1305_v27  ;;  %v1205_v29 = vmul.f32 %v2022_v45, %v1136_v28 }
 0x1bb   : > { %v1273_v30 = vadd.f32 %v2023_v50, %v1205_v29 }
 0x1bd   : > { %v1337_v31 = vmax.f32 %v1273_v30, 0.0 }
 0x1bf   : > { %1402 = vst.msk [vmem:[%s2336_s29 + $0x1f8] sm:$0xff] %vm1338_vm0, %v1337_v31 }
 0x1c0 PF: > { %s17_s20 = sadd.s32 1, %s2104_s20   ;;  %s2662_s15 = smov %s2088_s16 }
 0x1c1   : > { %p14_p0 = scmp.ge.s32.totalorder %s17_s20, 6   ;;  %s2663_s16 = smov %s2092_s17 }
 0x1c2   : > { %s2664_s17 = smov %s2182_s27  ;;  %s2665_s18 = smov %s2100_s19 }
 0x1c3   : > { %s2666_s19 = smov %s2668_s22  ;;  %16 = sbr.rel (!%p14_p0) target bundleno = 4 (0x4), region = 85 }
 0x1c8   :  { %1431 = vsyncpa [#allocation3], 1 }
 0x1c9   :  { %1433 = vsyncpa [#allocation3 + $0x1], 1 }

</bundles_post_ra>
